<compile_context>
chip_gen: v5e
topology: v5e:2x2
jax: 0.10.0
libtpu: 0.0.40
codegen_flags: <defaults>
</compile_context>

<pallas_src>
import functools

import jax
import jax.numpy as jnp
from jax import lax
from jax.experimental import pallas as pl
from jax.experimental.pallas import tpu as pltpu

_EPS = 1e-16          # Entropy._eps (deepclustering default)


def _iic_dual_kernel(x1_ref, x2_ref, marg_ref, cent_ref, entsum_ref,
                     joint_acc, ent_acc):
    """Accumulate-over-N-tiles + finalize for the IIC loss pieces.

    x1_ref / x2_ref : VMEM (TN, K) tiles of the two row-simplex matrices.
    Outputs (SMEM (1,1), written only on the last grid step):
      marg_ref   : H(joint.sum(0)) + H(joint.sum(1))
      cent_ref   : -sum(joint * log(joint + eps))
      entsum_ref : sum over rows of x_out1 of -sum_k x*log(x+eps)  (un-averaged)
    Scratch:
      joint_acc : VMEM (K,K) f32 accumulator of x1^T@x2 + x2^T@x1
      ent_acc   : VMEM (1,1) f32 accumulator of the row-entropy sum
    """
    i = pl.program_id(0)

    @pl.when(i == 0)
    def _init():
        joint_acc[...] = jnp.zeros_like(joint_acc)
        ent_acc[...] = jnp.zeros_like(ent_acc)

    x1 = x1_ref[...]          # feed MXU in native dtype; accumulate in f32
    x2 = x2_ref[...]

    # Symmetric joint contribution of this tile via two MXU products
    # (avoids an in-kernel (K,K) XLU transpose).  Contracting dim 0 of both
    # operands is the transposed-LHS MXU form (== x1.T @ x2).
    dims = (((0,), (0,)), ((), ()))
    j12 = lax.dot_general(x1, x2, dims, preferred_element_type=jnp.float32)
    j21 = lax.dot_general(x2, x1, dims, preferred_element_type=jnp.float32)
    joint_acc[...] += j12 + j21            # == P + P.T (unnormalized; /2 cancels)

    # Row-entropy of x_out1 for this tile (zero-padded rows contribute exactly 0).
    x1f = x1.astype(jnp.float32)
    ent_acc[...] += -jnp.sum(x1f * jnp.log(x1f + _EPS), keepdims=True)

    @pl.when(i == pl.num_programs(0) - 1)
    def _finalize():
        a = joint_acc[...]                          # symmetric, unnormalized
        inv_total = 1.0 / jnp.sum(a)                # scalar reciprocal, not (K,K) div
        p = a * inv_total                           # == sym-joint / sum(sym-joint)

        # Marginals of a symmetric p are identical: one lane-axis reduce, doubled.
        m = jnp.sum(p, axis=-1, keepdims=True)      # (K, 1)
        h = -jnp.sum(m * jnp.log(m + _EPS))
        marg_ref[0, 0] = 2.0 * h

        cent_ref[0, 0] = -jnp.sum(p * jnp.log(p + _EPS))
        entsum_ref[0, 0] = jnp.sum(ent_acc[...])


def _round_up(x, m):
    return (x + m - 1) // m * m


def _pad_rows(x, n_pad):
    n = x.shape[0]
    if n == n_pad:
        return x
    return jnp.pad(x, ((0, n_pad - n), (0, 0)))     # zero rows are exact no-ops


@functools.partial(jax.jit, static_argnames=("error", "c_lo", "c_hi"))
def _iic_forward(x_out1, x_out2, c_coef, *, error, c_lo, c_hi):
    """Returns (neg_mi, new_c_coef); everything stays on device (no host sync)."""
    n, k = x_out1.shape
    tn = min(512, _round_up(n, 8))          # batch tile: small VMEM footprint on all gens
    n_pad = _round_up(n, tn)
    x1 = _pad_rows(x_out1, n_pad)
    x2 = _pad_rows(x_out2, n_pad)
    grid = (n_pad // tn,)

    itemsize = jnp.dtype(x_out1.dtype).itemsize
    cost = pl.CostEstimate(
        flops=int(4 * n_pad * k * k + 4 * n_pad * k),
        transcendentals=int(n_pad * k + k * k + k),
        bytes_accessed=int(2 * n_pad * k * itemsize + 3 * 4),
    )

    smem_scalar = pl.BlockSpec(memory_space=pltpu.MemorySpace.SMEM)
    marg, cent, ent_sum = pl.pallas_call(
        _iic_dual_kernel,
        out_shape=(jax.ShapeDtypeStruct((1, 1), jnp.float32),
                   jax.ShapeDtypeStruct((1, 1), jnp.float32),
                   jax.ShapeDtypeStruct((1, 1), jnp.float32)),
        grid_spec=pltpu.PrefetchScalarGridSpec(
            num_scalar_prefetch=0,
            grid=grid,
            in_specs=[pl.BlockSpec((tn, k), lambda i: (i, 0)),
                      pl.BlockSpec((tn, k), lambda i: (i, 0))],
            out_specs=(smem_scalar, smem_scalar, smem_scalar),
            scratch_shapes=[pltpu.VMEM((k, k), jnp.float32),
                            pltpu.VMEM((1, 1), jnp.float32)]),
        compiler_params=pltpu.CompilerParams(
            dimension_semantics=("arbitrary",)),
        cost_estimate=cost,
    )(x1, x2)

    marginal = marg[0, 0]
    centropy = cent[0, 0]
    ent_mean = ent_sum[0, 0] * (1.0 / n)            # Entropy(x_out1), mean over true N

    c = jnp.asarray(c_coef, jnp.float32)
    mi = marginal - c * centropy
    neg_mi = -mi
    new_c = jnp.clip(c + jnp.abs(ent_mean) - error, c_lo, c_hi)
    return neg_mi, new_c


class CustomizedIICLossDual:
    """Stateful wrapper mirroring the PyTorch module (c_coef side effect).

    c_coef lives on device; its update (|Entropy(x_out1)| - error, clipped) is
    computed inside the jitted forward, so no blocking device->host read per step.
    """

    def __init__(self, error=0.05, c_range=(-0.8, 1.0)):
        self.error = float(error)
        self.c_range = (float(c_range[0]), float(c_range[1]))
        self.c_coef = jnp.asarray(1.0, jnp.float32)

    def __call__(self, x_out1, x_out2):
        neg_mi, new_c = _iic_forward(
            x_out1, x_out2, self.c_coef,
            error=self.error, c_lo=self.c_range[0], c_hi=self.c_range[1])
        self.c_coef = new_c            # device scalar, used by the next call
        return neg_mi, neg_mi


# ---------------------------------------------------------------------------
# pure-JAX references (for sanity checking)
# ---------------------------------------------------------------------------
def _reference(x1, x2, c_coef):
    p = (x1[:, :, None] * x2[:, None, :]).sum(0)
    p = (p + p.T) / 2.0
    p = p / p.sum()
    h = lambda v: -(v * jnp.log(v + _EPS)).sum()
    marginal = h(p.sum(0)) + h(p.sum(1))
    centropy = -(p * jnp.log(p + _EPS)).sum()
    mi = marginal - c_coef * centropy
    return -mi


def _reference_new_c(c, x1, error, c_range):
    ent = jnp.mean(-jnp.sum(x1 * jnp.log(x1 + _EPS), axis=-1))
    return float(jnp.clip(c + jnp.abs(ent) - error, c_range[0], c_range[1]))


if __name__ == "__main__":
    key = jax.random.PRNGKey(0)
    k1, k2, k3, k4 = jax.random.split(key, 4)

    # --- small case (single tile) ---
    N, K = 32, 16
    x_out1 = jax.nn.softmax(jax.random.normal(k1, (N, K), jnp.float32), axis=-1)
    x_out2 = jax.nn.softmax(jax.random.normal(k2, (N, K), jnp.float32), axis=-1)

    loss_mod = CustomizedIICLossDual()
    loss_a, loss_b = loss_mod(x_out1, x_out2)
    jax.block_until_ready(loss_a)
    ref1 = _reference(x_out1, x_out2, 1.0)
    assert jnp.allclose(loss_a, ref1, atol=1e-4, rtol=1e-4), (loss_a, ref1)
    assert jnp.allclose(loss_a, loss_b)

    # Second call exercises the on-device c_coef update path.
    ref_c = _reference_new_c(1.0, x_out1, 0.05, (-0.8, 1.0))
    loss_a2, _ = loss_mod(x_out1, x_out2)
    jax.block_until_ready(loss_a2)
    ref2 = _reference(x_out1, x_out2, ref_c)
    assert jnp.allclose(loss_a2, ref2, atol=1e-4, rtol=1e-4), (loss_a2, ref2)

    # --- multi-tile + zero-padded remainder (exercises the grid reduction) ---
    N2, K2 = 600, 32
    y1 = jax.nn.softmax(jax.random.normal(k3, (N2, K2), jnp.float32), axis=-1)
    y2 = jax.nn.softmax(jax.random.normal(k4, (N2, K2), jnp.float32), axis=-1)
    mod2 = CustomizedIICLossDual()
    la, _ = mod2(y1, y2)
    jax.block_until_ready(la)
    ref_l = _reference(y1, y2, 1.0)
    assert jnp.allclose(la, ref_l, atol=1e-4, rtol=1e-4), (la, ref_l)

    print("KERNEL_OK")
</pallas_src>

<mosaic_0001>
module attributes {stable_mosaic.version = 11 : i64} {
  func.func @_iic_dual_kernel(%arg0: i32, %arg1: memref<32x16xf32, #tpu.memory_space<vmem>>, %arg2: memref<32x16xf32, #tpu.memory_space<vmem>>, %arg3: memref<1x1xf32, #tpu.memory_space<smem>>, %arg4: memref<1x1xf32, #tpu.memory_space<smem>>, %arg5: memref<1x1xf32, #tpu.memory_space<smem>>, %arg6: memref<16x16xf32, #tpu.memory_space<vmem>>, %arg7: memref<1x1xf32, #tpu.memory_space<vmem>>) attributes {dimension_semantics = [#tpu.dimension_semantics<arbitrary>], iteration_bounds = array<i64: 1>, scalar_prefetch = 0 : i64, scratch_operands = 2 : i64, tpu.core_type = #tpu.core_type<tc>, window_params = [{transform_indices = @transform_0, window_bounds = array<i64: 32, 16>}, {transform_indices = @transform_1, window_bounds = array<i64: 32, 16>}, {transform_indices = @transform_2, window_bounds = array<i64: 1, 1>}, {transform_indices = @transform_3, window_bounds = array<i64: 1, 1>}, {transform_indices = @transform_4, window_bounds = array<i64: 1, 1>}]} {
    %c0_i32 = arith.constant 0 : i32
    %0 = arith.cmpi eq, %arg0, %c0_i32 : i32
    %1 = arith.extui %0 : i1 to i32
    %c0_i32_0 = arith.constant 0 : i32
    %2 = arith.cmpi ne, %1, %c0_i32_0 : i32
    scf.if %2 {
      %cst_18 = arith.constant 0.000000e+00 : f32
      %28 = vector.broadcast %cst_18 : f32 to vector<16x16xf32>
      %c0_19 = arith.constant 0 : index
      %c0_20 = arith.constant 0 : index
      %29 = vector.load %arg6[%c0_19, %c0_20] : memref<16x16xf32, #tpu.memory_space<vmem>>, vector<16x16xf32>
      tpu.vector_store %arg6[%c0_19, %c0_20], %28 {strides = array<i32>} : memref<16x16xf32, #tpu.memory_space<vmem>>, vector<16x16xf32>,
      %cst_21 = arith.constant 0.000000e+00 : f32
      %30 = vector.broadcast %cst_21 : f32 to vector<1x1xf32>
      %c0_22 = arith.constant 0 : index
      %c0_23 = arith.constant 0 : index
      %31 = vector.load %arg7[%c0_22, %c0_23] : memref<1x1xf32, #tpu.memory_space<vmem>>, vector<1x1xf32>
      tpu.vector_store %arg7[%c0_22, %c0_23], %30 {strides = array<i32>} : memref<1x1xf32, #tpu.memory_space<vmem>>, vector<1x1xf32>,
    } else {
    }
    %c0 = arith.constant 0 : index
    %c0_1 = arith.constant 0 : index
    %3 = vector.load %arg1[%c0, %c0_1] : memref<32x16xf32, #tpu.memory_space<vmem>>, vector<32x16xf32>
    %c0_2 = arith.constant 0 : index
    %c0_3 = arith.constant 0 : index
    %4 = vector.load %arg2[%c0_2, %c0_3] : memref<32x16xf32, #tpu.memory_space<vmem>>, vector<32x16xf32>
    %cst = arith.constant dense<0.000000e+00> : vector<16x16xf32>
    %5 = tpu.matmul %3, %4, %cst {dimension_numbers = #tpu.dot_dimension_numbers<[0], [0], [1], [1], [0, 1, 1, 1], [], []>} : vector<32x16xf32>, vector<32x16xf32>, vector<16x16xf32> -> vector<16x16xf32>
    %cst_4 = arith.constant dense<0.000000e+00> : vector<16x16xf32>
    %6 = tpu.matmul %4, %3, %cst_4 {dimension_numbers = #tpu.dot_dimension_numbers<[0], [0], [1], [1], [0, 1, 1, 1], [], []>} : vector<32x16xf32>, vector<32x16xf32>, vector<16x16xf32> -> vector<16x16xf32>
    %c0_5 = arith.constant 0 : index
    %c0_6 = arith.constant 0 : index
    %7 = vector.load %arg6[%c0_5, %c0_6] : memref<16x16xf32, #tpu.memory_space<vmem>>, vector<16x16xf32>
    %8 = arith.addf %5, %6 : vector<16x16xf32>
    %9 = arith.addf %7, %8 : vector<16x16xf32>
    %c0_7 = arith.constant 0 : index
    %c0_8 = arith.constant 0 : index
    %10 = vector.load %arg6[%c0_7, %c0_8] : memref<16x16xf32, #tpu.memory_space<vmem>>, vector<16x16xf32>
    tpu.vector_store %arg6[%c0_7, %c0_8], %9 {strides = array<i32>} : memref<16x16xf32, #tpu.memory_space<vmem>>, vector<16x16xf32>,
    %c0_9 = arith.constant 0 : index
    %c0_10 = arith.constant 0 : index
    %11 = vector.load %arg7[%c0_9, %c0_10] : memref<1x1xf32, #tpu.memory_space<vmem>>, vector<1x1xf32>
    %cst_11 = arith.constant 1.000000e-16 : f32
    %12 = vector.broadcast %cst_11 : f32 to vector<32x16xf32>
    %13 = arith.addf %3, %12 : vector<32x16xf32>
    %14 = math.log %13 : vector<32x16xf32>
    %15 = arith.mulf %3, %14 : vector<32x16xf32>
    %16 = vector.shape_cast %15 : vector<32x16xf32> to vector<1x32x16xf32>
    %cst_12 = arith.constant dense<0.000000e+00> : vector<1xf32>
    %17 = vector.multi_reduction <add>, %16, %cst_12 [1, 2] : vector<1x32x16xf32> to vector<1xf32>
    %18 = vector.shape_cast %17 : vector<1xf32> to vector<1x1x1xf32>
    %19 = vector.extract %18[0, 0, 0] : f32 from vector<1x1x1xf32>
    %20 = vector.broadcast %19 : f32 to vector<1x1xf32>
    %cst_13 = arith.constant 0.000000e+00 : f32
    %21 = vector.broadcast %cst_13 : f32 to vector<1x1xf32>
    %22 = arith.subf %21, %20 : vector<1x1xf32>
    %23 = arith.addf %11, %22 : vector<1x1xf32>
    %c0_14 = arith.constant 0 : index
    %c0_15 = arith.constant 0 : index
    %24 = vector.load %arg7[%c0_14, %c0_15] : memref<1x1xf32, #tpu.memory_space<vmem>>, vector<1x1xf32>
    tpu.vector_store %arg7[%c0_14, %c0_15], %23 {strides = array<i32>} : memref<1x1xf32, #tpu.memory_space<vmem>>, vector<1x1xf32>,
    %c0_i32_16 = arith.constant 0 : i32
    %25 = arith.cmpi eq, %arg0, %c0_i32_16 : i32
    %26 = arith.extui %25 : i1 to i32
    %c0_i32_17 = arith.constant 0 : i32
    %27 = arith.cmpi ne, %26, %c0_i32_17 : i32
    scf.if %27 {
      %c0_18 = arith.constant 0 : index
      %c0_19 = arith.constant 0 : index
      %28 = vector.load %arg6[%c0_18, %c0_19] : memref<16x16xf32, #tpu.memory_space<vmem>>, vector<16x16xf32>
      %29 = vector.shape_cast %28 : vector<16x16xf32> to vector<1x16x16xf32>
      %cst_20 = arith.constant dense<0.000000e+00> : vector<1xf32>
      %30 = vector.multi_reduction <add>, %29, %cst_20 [1, 2] : vector<1x16x16xf32> to vector<1xf32>
      %31 = vector.shape_cast %30 : vector<1xf32> to vector<1x1x1xf32>
      %32 = vector.extract %31[0, 0, 0] : f32 from vector<1x1x1xf32>
      %cst_21 = arith.constant 1.000000e+00 : f32
      %33 = arith.divf %cst_21, %32 : f32
      %34 = vector.broadcast %33 : f32 to vector<16x16xf32>
      %35 = arith.mulf %28, %34 : vector<16x16xf32>
      %cst_22 = arith.constant dense<0.000000e+00> : vector<16xf32>
      %36 = vector.multi_reduction <add>, %35, %cst_22 [1] : vector<16x16xf32> to vector<16xf32>
      %37 = vector.shape_cast %36 : vector<16xf32> to vector<16x1xf32>
      %cst_23 = arith.constant 1.000000e-16 : f32
      %38 = vector.broadcast %cst_23 : f32 to vector<16x1xf32>
      %39 = arith.addf %37, %38 : vector<16x1xf32>
      %40 = math.log %39 : vector<16x1xf32>
      %41 = arith.mulf %37, %40 : vector<16x1xf32>
      %42 = vector.shape_cast %41 : vector<16x1xf32> to vector<1x16x1xf32>
      %cst_24 = arith.constant dense<0.000000e+00> : vector<1xf32>
      %43 = vector.multi_reduction <add>, %42, %cst_24 [1, 2] : vector<1x16x1xf32> to vector<1xf32>
      %44 = vector.shape_cast %43 : vector<1xf32> to vector<1x1x1xf32>
      %45 = vector.extract %44[0, 0, 0] : f32 from vector<1x1x1xf32>
      %cst_25 = arith.constant 0.000000e+00 : f32
      %46 = arith.subf %cst_25, %45 : f32
      %cst_26 = arith.constant 2.000000e+00 : f32
      %47 = arith.mulf %cst_26, %46 : f32
      %c0_27 = arith.constant 0 : index
      %c0_28 = arith.constant 0 : index
      %48 = memref.load %arg3[%c0_27, %c0_28] : memref<1x1xf32, #tpu.memory_space<smem>>
      memref.store %47, %arg3[%c0_27, %c0_28] : memref<1x1xf32, #tpu.memory_space<smem>>
      %cst_29 = arith.constant 1.000000e-16 : f32
      %49 = vector.broadcast %cst_29 : f32 to vector<16x16xf32>
      %50 = arith.addf %35, %49 : vector<16x16xf32>
      %51 = math.log %50 : vector<16x16xf32>
      %52 = arith.mulf %35, %51 : vector<16x16xf32>
      %53 = vector.shape_cast %52 : vector<16x16xf32> to vector<1x16x16xf32>
      %cst_30 = arith.constant dense<0.000000e+00> : vector<1xf32>
      %54 = vector.multi_reduction <add>, %53, %cst_30 [1, 2] : vector<1x16x16xf32> to vector<1xf32>
      %55 = vector.shape_cast %54 : vector<1xf32> to vector<1x1x1xf32>
      %56 = vector.extract %55[0, 0, 0] : f32 from vector<1x1x1xf32>
      %cst_31 = arith.constant 0.000000e+00 : f32
      %57 = arith.subf %cst_31, %56 : f32
      %c0_32 = arith.constant 0 : index
      %c0_33 = arith.constant 0 : index
      %58 = memref.load %arg4[%c0_32, %c0_33] : memref<1x1xf32, #tpu.memory_space<smem>>
      memref.store %57, %arg4[%c0_32, %c0_33] : memref<1x1xf32, #tpu.memory_space<smem>>
      %c0_34 = arith.constant 0 : index
      %c0_35 = arith.constant 0 : index
      %59 = vector.load %arg7[%c0_34, %c0_35] : memref<1x1xf32, #tpu.memory_space<vmem>>, vector<1x1xf32>
      %60 = vector.shape_cast %59 : vector<1x1xf32> to vector<1x1x1xf32>
      %cst_36 = arith.constant dense<0.000000e+00> : vector<1xf32>
      %61 = vector.multi_reduction <add>, %60, %cst_36 [1, 2] : vector<1x1x1xf32> to vector<1xf32>
      %62 = vector.shape_cast %61 : vector<1xf32> to vector<1x1x1xf32>
      %63 = vector.extract %62[0, 0, 0] : f32 from vector<1x1x1xf32>
      %c0_37 = arith.constant 0 : index
      %c0_38 = arith.constant 0 : index
      %64 = memref.load %arg5[%c0_37, %c0_38] : memref<1x1xf32, #tpu.memory_space<smem>>
      memref.store %63, %arg5[%c0_37, %c0_38] : memref<1x1xf32, #tpu.memory_space<smem>>
    } else {
    }
    return
  }
  func.func @transform_0(%arg0: i32) -> (i32, i32) {
    %c0_i32 = arith.constant 0 : i32
    %c0_i32_0 = arith.constant 0 : i32
    return %arg0, %c0_i32 : i32, i32
  }
  func.func @transform_1(%arg0: i32) -> (i32, i32) {
    %c0_i32 = arith.constant 0 : i32
    %c0_i32_0 = arith.constant 0 : i32
    return %arg0, %c0_i32 : i32, i32
  }
  func.func @transform_2(%arg0: i32) -> (i32, i32) {
    %c0_i32 = arith.constant 0 : i32
    %c0_i32_0 = arith.constant 0 : i32
    %c0_i32_1 = arith.constant 0 : i32
    return %c0_i32, %c0_i32_0 : i32, i32
  }
  func.func @transform_3(%arg0: i32) -> (i32, i32) {
    %c0_i32 = arith.constant 0 : i32
    %c0_i32_0 = arith.constant 0 : i32
    %c0_i32_1 = arith.constant 0 : i32
    return %c0_i32, %c0_i32_0 : i32, i32
  }
  func.func @transform_4(%arg0: i32) -> (i32, i32) {
    %c0_i32 = arith.constant 0 : i32
    %c0_i32_0 = arith.constant 0 : i32
    %c0_i32_1 = arith.constant 0 : i32
    return %c0_i32, %c0_i32_0 : i32, i32
  }
}

</mosaic_0001>

<bundles_post_ra>
// kernel: _iic_forward.1
= control target key start
LH: loop header
LB: loop body
LE: loop exit
PB: predicated region body
PF: predicated region fallthrough
CT: control target
= control target key end

     0   :  { %10 = vsyncpa [#allocation5], 0  ;;  %s500_s0 = inlined_call_operand.vmem [shape: f32[32,16], index: 0, kind: input, shape index: {}]   ;;  %s501_s1 = inlined_call_operand.vmem [shape: f32[32,16], index: 1, kind: input, shape index: {}]   ;;  %s502_s2 = inlined_call_operand.hbm [shape: f32[1,1], index: 2, kind: output, shape index: {0}]   ;;  %s503_s3 = inlined_call_operand.hbm [shape: f32[1,1], index: 3, kind: output, shape index: {1}]   ;;  %s504_s4 = inlined_call_operand.hbm [shape: f32[1,1], index: 4, kind: output, shape index: {2}]  }
   0x1   :  { %v29_v0 = vld [vmem:[%s501_s1] sm:$0xff]  ;;  %v32_v2 = vld [vmem:[%s501_s1 + $0x18] sm:$0xff] }
   0x2   :  { %v25_v1 = vld [vmem:[%s500_s0] sm:$0xff]  ;;  %33 = vxpose.xlu0.b32.start [1/4] (short) (narrow) %v29_v0, 16  ;;  %v28_v3 = vld [vmem:[%s500_s0 + $0x18] sm:$0xff] }
   0x3   :  { %97 = vxpose.xlu1.b32.start [1/4] (short) (narrow) %v25_v1, 16 }
   0x4   :  { %11 = vsyncpa [#allocation7], 0  ;;  %84 = vmatpush.msra.mxu0 %v28_v3  ;;  %147 = vmatpush.msra.mxu1 %v32_v2  ;;  %v31_v4 = vld [vmem:[%s501_s1 + $0x10] sm:$0xff]  ;;  %v30_v6 = vld [vmem:[%s501_s1 + $0x8] sm:$0xff]  ;;  %vm65_vm0 = vcmask 261120   ;;  %vm20_vm1 = vcmask 130048  }
   0x5   :  { %v27_v5 = vld [vmem:[%s500_s0 + $0x10] sm:$0xff]  ;;  %342 = vmatpush.msra.mxu2 %v28_v3  ;;  %346 = vmatpush.msra.mxu3 %v32_v2  ;;  %v26_v7 = vld [vmem:[%s500_s0 + $0x8] sm:$0xff]  ;;  %v424_v12 = vmov 0.0   ;;  %v164_v13 = vadd.f32 1e-16, %v25_v1  ;;  %vm23_vm2 = vcmask 0  }
   0x6   :  { %85 = vmatpush.msra.mxu0 %v27_v5  ;;  %148 = vmatpush.msra.mxu1 %v31_v4  ;;  %21 = vst.msk [vmem:[#allocation2] sm:$0xff] %vm20_vm1, %v424_v12  ;;  %v165_v14 = vadd.f32 1e-16, %v26_v7  ;;  %v166_v15 = vadd.f32 1e-16, %v27_v5  ;;  %vm251_vm7 = vcmask 7168  }
   0x7   :  { %343 = vmatpush.msra.mxu2 %v27_v5  ;;  %347 = vmatpush.msra.mxu3 %v31_v4  ;;  %22 = vst.msk [vmem:[#allocation2 + $0x8] sm:$0xff] %vm20_vm1, %v424_v12  ;;  %366 = vlog2.f32 %v164_v13  ;;  %v167_v16 = vadd.f32 1e-16, %v28_v3  ;;  %s310_s8 = sshll.u32 %s503_s3, 4  ;;  %s301_s11 = sshll.u32 %s502_s2, 4  ;;  %s311_s8 = int_to_ptr.hbm [resolvable:$true] %s310_s8  ;;  %s302_s11 = int_to_ptr.hbm [resolvable:$true] %s301_s11 }
   0x8   :  { %86 = vmatpush.msra.mxu0 %v26_v7  ;;  %149 = vmatpush.msra.mxu1 %v30_v6  ;;  %368 = vlog2.f32 %v165_v14  ;;  %24 = vst.msk [vmem:[#allocation3] sm:$0x1] %vm23_vm2, %v424_v12  ;;  %s319_s15 = sshll.u32 %s504_s4, 4  ;;  %s425_s3 = smov [#allocation6]   ;;  %s320_s15 = int_to_ptr.hbm [resolvable:$true] %s319_s15 }
   0x9   :  { %344 = vmatpush.msra.mxu2 %v26_v7  ;;  %348 = vmatpush.msra.mxu3 %v30_v6  ;;  %370 = vlog2.f32 %v166_v15  ;;  %s426_s21 = smov [#allocation4]   ;;  %s427_s2 = smov [#allocation8]  }
   0xa   :  { %34 = vxpose.xlu0.b32.cont [2/4] (short) (narrow) %v30_v6, 16  ;;  %150 = vmatpush.msra.mxu1 %v29_v0  ;;  %372 = vlog2.f32 %v167_v16 }
   0xb   :  { %98 = vxpose.xlu1.b32.cont [2/4] (short) (narrow) %v26_v7, 16  ;;  %87 = vmatpush.msra.mxu0 %v25_v1 }
   0xc   :  { %349 = vmatpush.msra.mxu3 %v29_v0  ;;  %345 = vmatpush.msra.mxu2 %v25_v1 }
   0xd   :  { %v367_v17 = vpop.eup %366  ;;  %v95_v37 = vld [vmem:[#allocation2] sm:$0xff] }
   0xe   :  { %v369_v18 = vpop.eup %368  ;;  %v169_v19 = vmul.f32 0.6931472, %v367_v17  ;;  %v96_v42 = vld [vmem:[#allocation2 + $0x8] sm:$0xff] }
   0xf   :  { %v371_v20 = vpop.eup %370  ;;  %v171_v21 = vmul.f32 0.6931472, %v369_v18 }
  0x10   :  { %v173_v22 = vmul.f32 0.6931472, %v371_v20  ;;  %v176_v23 = vmul.f32 %v169_v19, %v25_v1  ;;  %v373_v24 = vpop.eup %372  ;;  %v163_v1 = vld [vmem:[#allocation3] sm:$0x1] }
  0x11   :  { %v177_v25 = vmul.f32 %v171_v21, %v26_v7  ;;  %v175_v26 = vmul.f32 0.6931472, %v373_v24 }
  0x12   :  { %35 = vxpose.xlu0.b32.cont [3/4] (short) (narrow) %v31_v4, 16  ;;  %v178_v27 = vmul.f32 %v173_v22, %v27_v5  ;;  %v180_v28 = vsel %vm20_vm1, %v176_v23, 0.0 }
  0x13   :  { %99 = vxpose.xlu1.b32.cont [3/4] (short) (narrow) %v27_v5, 16  ;;  %v181_v29 = vsel %vm20_vm1, %v177_v25, 0.0  ;;  %v179_v30 = vmul.f32 %v175_v26, %v28_v3 }
  0x14   :  { %v182_v31 = vadd.f32 %v181_v29, %v180_v28  ;;  %v183_v32 = vsel %vm20_vm1, %v178_v27, 0.0 }
  0x15   :  { %v185_v34 = vsel %vm20_vm1, %v179_v30, 0.0 }
  0x16   :  { %v184_v33 = vadd.f32 %v183_v32, %v182_v31 }
  0x18   :  { %v186_v35 = vadd.f32 %v185_v34, %v184_v33 }
  0x1a   :  { %36 = vxpose.xlu0.b32.end [4/4] (short) (narrow) %v32_v2, 16  ;;  %187 = vadd.xlane.f32.xlu2 %v186_v35 }
  0x1b   :  { %100 = vxpose.xlu1.b32.end [4/4] (short) (narrow) %v28_v3, 16 }
  0x8d   :  { %v188_v51 = vpop.xlane.xlu2 %187 }
  0x8e   :  { %v189_v52 = vrot.slane %v188_v51, 4 }
  0x90   :  { %v190_v53 = vadd.f32 %v189_v52, %v188_v51 }
  0x92   :  { %v191_v54 = vrot.slane %v190_v53, 2 }
  0x94   :  { %v192_v55 = vadd.f32 %v191_v54, %v190_v53 }
  0x96   :  { %v193_v56 = vrot.slane %v192_v55, 1 }
  0x98   :  { %v194_v57 = vadd.f32 %v193_v56, %v192_v55 }
  0x9a   :  { %350 = vpush %v194_v57 }
  0xa6   :  { %v49_v8 = vpop.trf.xlu0 }
  0xa7   :  { %v113_v9 = vpop.trf.xlu1  ;;  %338 = vmatmul.msk.f32.vlgmr.msra.gmra.mxu0 %vm65_vm0, %v49_v8 }
  0xa8   :  { %340 = vmatmul.msk.f32.vlgmr.msra.gmra.mxu1 %vm65_vm0, %v113_v9 }
  0xae   :  { %v50_v10 = vpop.trf.xlu0 }
  0xaf   :  { %v114_v11 = vpop.trf.xlu1  ;;  %339 = vmatmul.msk.f32.vlgmr.msra.gmra.mxu2 %vm65_vm0, %v50_v10 }
  0xb0   :  { %341 = vmatmul.msk.f32.vlgmr.msra.gmra.mxu3 %vm65_vm0, %v114_v11 }
  0xcb   :  { %s351_s0 = spop %350 }
  0xcc   :  { %v196_v2 = vstv %s351_s0 }
  0xcd   :  { %v197_v3 = vsub.f32 0.0, %v196_v2 }
  0xcf   :  { %v198_v4 = vadd.f32 %v197_v3, %v163_v1 }
  0xd1   :  { %200 = vst.msk [vmem:[#allocation3] sm:$0x1] %vm23_vm2, %v198_v4 }
 0x124   :  { %v89_v36 = vpop.f32.mrf.mxu0 }
 0x125   :  { %v152_v38 = vpop.f32.mrf.mxu1 }
 0x126   :  { %v153_v39 = vadd.f32 %v152_v38, %v89_v36 }
 0x128   :  { %v158_v40 = vadd.f32 %v153_v39, %v95_v37 }
 0x12a   :  { %161 = vst.msk [vmem:[#allocation2] sm:$0xff] %vm20_vm1, %v158_v40 }
 0x131   :  { %v204_v46 = vld [vmem:[#allocation2] sm:$0xff] }
 0x132   :  { %v92_v41 = vpop.f32.mrf.mxu2  ;;  %v206_v48 = vsel %vm20_vm1, %v204_v46, 0.0 }
 0x133   :  { %v155_v43 = vpop.f32.mrf.mxu3 }
 0x134   :  { %v156_v44 = vadd.f32 %v155_v43, %v92_v41 }
 0x136   :  { %v159_v45 = vadd.f32 %v156_v44, %v96_v42 }
 0x138   :  { %162 = vst.msk [vmem:[#allocation2 + $0x8] sm:$0xff] %vm20_vm1, %v159_v45 }
 0x13f   :  { %v205_v47 = vld [vmem:[#allocation2 + $0x8] sm:$0xff] }
 0x140   :  { %v207_v49 = vsel %vm20_vm1, %v205_v47, 0.0 }
 0x141   :  { %v208_v50 = vadd.f32 %v207_v49, %v206_v48 }
 0x143   :  { %209 = vadd.xlane.f32.xlu2 %v208_v50 }
 0x1b6   :  { %v210_v58 = vpop.xlane.xlu2 %209 }
 0x1b7   :  { %v211_v59 = vrot.slane %v210_v58, 4 }
 0x1b9   :  { %v212_v60 = vadd.f32 %v211_v59, %v210_v58  ;;  %v291_v59 = vld [vmem:[#allocation3] sm:$0x1] }
 0x1bb   :  { %v213_v61 = vrot.slane %v212_v60, 2 }
 0x1bd   :  { %v214_v62 = vadd.f32 %v213_v61, %v212_v60 }
 0x1bf   :  { %v215_v63 = vrot.slane %v214_v62, 1 }
 0x1c1   :  { %v216_v0 = vadd.f32 %v215_v63, %v214_v62 }
 0x1c3   :  { %352 = vpush %v216_v0 }
 0x1f4   :  { %s353_s1 = spop %352 }
 0x1f5   :  { %v218_v5 = vstv %s353_s1 }
 0x1f6   :  { %374 = vrcp.f32 %v218_v5  ;;  %v230_v9 = vand.u32 2147483648, %v218_v5  ;;  %v228_v11 = vand.u32 2147483647, %v218_v5  ;;  %vm224_vm4 = vweird.f32 %v218_v5 }
 0x1f8   :  { %v231_v13 = vor.u32 1.1754944e-38, %v230_v9  ;;  %vm229_vm6 = vcmp.eq.f32.partialorder %v228_v11, 8.507059e+37 }
 0x1fc   :  { %v375_v6 = vpop.eup %374 }
 0x1fd   :  { %v220_v7 = vmul.f32 %v375_v6, %v218_v5  ;;  %vm225_vm3 = vweird.f32 %v375_v6 }
 0x1fe   :  { %vm226_vm5 = vmor %vm224_vm4, %vm225_vm3 }
 0x1ff   :  { %v221_v8 = vsub.f32 1.0, %v220_v7 }
 0x201   :  { %v222_v10 = vmul.f32 %v375_v6, %v221_v8 }
 0x203   :  { %v223_v12 = vadd.f32 %v375_v6, %v222_v10 }
 0x205   :  { %v227_v14 = vsel %vm226_vm5, %v375_v6, %v223_v12 }
 0x206   :  { %v232_v15 = vsel %vm229_vm6, %v231_v13, %v227_v14 }
 0x207   :  { %354 = vpush %v232_v15 }
 0x238   :  { %s355_s5 = spop %354 }
 0x239   :  { %v234_v16 = vstv %s355_s5 }
 0x23a   :  { %v235_v17 = vmul.f32 %v234_v16, %v204_v46  ;;  %v236_v18 = vmul.f32 %v234_v16, %v205_v47 }
 0x23c   :  { %v268_v19 = vadd.f32 1e-16, %v235_v17  ;;  %v269_v20 = vadd.f32 1e-16, %v236_v18  ;;  %v237_v21 = vsel %vm20_vm1, %v235_v17, 0.0  ;;  %v240_v23 = vsel %vm20_vm1, %v236_v18, 0.0 }
 0x23d   :  { %238 = vadd.xlane.f32.xlu2 %v237_v21 }
 0x23e   :  { %376 = vlog2.f32 %v268_v19 }
 0x23f   :  { %378 = vlog2.f32 %v269_v20 }
 0x244   :  { %v377_v22 = vpop.eup %376 }
 0x245   :  { %v379_v24 = vpop.eup %378  ;;  %241 = vadd.xlane.f32.xlu2 %v240_v23  ;;  %v271_v25 = vmul.f32 0.6931472, %v377_v22 }
 0x246   :  { %v273_v26 = vmul.f32 0.6931472, %v379_v24 }
 0x247   :  { %v274_v27 = vmul.f32 %v271_v25, %v235_v17 }
 0x248   :  { %v275_v28 = vmul.f32 %v273_v26, %v236_v18 }
 0x249   :  { %v276_v29 = vsel %vm20_vm1, %v274_v27, 0.0 }
 0x24a   :  { %v277_v30 = vsel %vm20_vm1, %v275_v28, 0.0 }
 0x24b   :  { %v278_v31 = vadd.f32 %v277_v30, %v276_v29 }
 0x24d   :  { %279 = vadd.xlane.f32.xlu1 %v278_v31 }
 0x2b0   :  { %v239_v32 = vpop.xlane.xlu2 %238 }
 0x2b1   :  { %v243_v33 = vadd.f32 1e-16, %v239_v32 }
 0x2b3   :  { %380 = vlog2.f32 %v243_v33 }
 0x2b8   :  { %v242_v34 = vpop.xlane.xlu2 %241 }
 0x2b9   :  { %v244_v35 = vadd.f32 1e-16, %v242_v34  ;;  %v381_v36 = vpop.eup %380 }
 0x2ba   :  { %v246_v37 = vmul.f32 0.6931472, %v381_v36 }
 0x2bb   :  { %382 = vlog2.f32 %v244_v35 }
 0x2bc   :  { %v249_v39 = vmul.f32 %v246_v37, %v239_v32 }
 0x2be   :  { %v252_v42 = vsel %vm251_vm7, %v249_v39, 0.0 }
 0x2c0   :  { %v280_v45 = vpop.xlane.xlu1 %279 }
 0x2c1   :  { %v383_v38 = vpop.eup %382  ;;  %v281_v46 = vrot.slane %v280_v45, 4 }
 0x2c2   :  { %v248_v40 = vmul.f32 0.6931472, %v383_v38 }
 0x2c3   :  { %v282_v47 = vadd.f32 %v281_v46, %v280_v45 }
 0x2c4   :  { %v250_v41 = vmul.f32 %v248_v40, %v242_v34 }
 0x2c5   :  { %v283_v48 = vrot.slane %v282_v47, 2 }
 0x2c6   :  { %v253_v43 = vsel %vm251_vm7, %v250_v41, 0.0 }
 0x2c7   :  { %v254_v44 = vadd.f32 %v253_v43, %v252_v42  ;;  %v284_v52 = vadd.f32 %v283_v48, %v282_v47 }
 0x2c9   :  { %255 = vadd.xlane.f32.xlu0 %v254_v44  ;;  %v285_v55 = vrot.slane %v284_v52, 1 }
 0x2cb   :  { %v286_v58 = vadd.f32 %v285_v55, %v284_v52 }
 0x33c   :  { %v256_v49 = vpop.xlane.xlu0 %255 }
 0x33d   :  { %v257_v50 = vrot.slane %v256_v49, 4 }
 0x33f   :  { %v258_v51 = vadd.f32 %v257_v50, %v256_v49 }
 0x341   :  { %v259_v53 = vrot.slane %v258_v51, 2 }
 0x343   :  { %v260_v54 = vadd.f32 %v259_v53, %v258_v51 }
 0x345   :  { %v261_v56 = vrot.slane %v260_v54, 1 }
 0x347   :  { %v262_v57 = vadd.f32 %v261_v56, %v260_v54 }
 0x349   :  { %356 = vpush %v262_v57 }
 0x34a   :  { %358 = vpush %v286_v58 }
 0x34b   :  { %360 = vpush %v291_v59 }
 0x37a   :  { %s357_s12 = spop %356 }
 0x37b   :  { %s264_s16 = ssub.f32 0.0, %s357_s12  ;;  %s359_s17 = spop %358 }
 0x37c   :  { %s288_s18 = ssub.f32 0.0, %s359_s17  ;;  %s361_s19 = spop %360 }
 0x37d   :  { %s265_s20 = smul.f32 2.0, %s264_s16  ;;  %295 = sst [smem:[#allocation8]] %s361_s19 }
 0x37e   :  { %290 = sst [smem:[#allocation6]] %s288_s18 }
 0x37f   :  { %267 = sst [smem:[#allocation4]] %s265_s20 }
 0x380   :  { %313 = dma.smem_to_hbm %s425_s3, 16, %s311_s8, [#allocation7]  }
 0x381   :  { %304 = dma.smem_to_hbm %s426_s21, 16, %s302_s11, [#allocation5]  }
 0x382   :  { %322 = dma.smem_to_hbm %s427_s2, 16, %s320_s15, [#allocation7]  }
 0x383   :  { %420 = dma.done.wait [#allocation5], 16  }
 0x384   :  { %421 = vsyncadd [#allocation5], 4294967280 }
 0x385   :  { %422 = dma.done.wait [#allocation7], 32  }
 0x386   :  { %423 = vsyncadd [#allocation7], 4294967264 }
 0x387   :  { %335 = sfence }
 0x388   :  { %336 = vsyncpa [#allocation5], 1 }
 0x389   :  { %337 = vsyncpa [#allocation7], 1 }

</bundles_post_ra>
